<compile_context>
chip_gen: v6e
topology: v6e:2x2x1
jax: 0.10.0
libtpu: 0.0.40
codegen_flags: <defaults>
</compile_context>

<pallas_src>
import functools

import jax
import jax.numpy as jnp
from jax.experimental import pallas as pl
from jax.experimental.pallas import tpu as pltpu

_LANE = 128


def _svd_linear_kernel(x_ref, ut_ref, wst_ref, b_ref, o_ref, *, compute_dtype):
    # x_ref   : (tm, in_dim)      row tile, original input dtype
    # ut_ref  : (in_dim, m_pad)   U.T, resident whole in VMEM (compute dtype)
    # wst_ref : (m_pad, out_pad)  W_s.T, resident whole in VMEM (compute dtype)
    # b_ref   : (1, out_pad)      bias, f32
    # o_ref   : (tm, out_pad)
    x = x_ref[...].astype(compute_dtype)
    sketch = jnp.dot(x, ut_ref[...], preferred_element_type=jnp.float32)
    # Drop the f32 accumulator back to the compute dtype so the second dot
    # also runs on the fast (bf16) MXU path.
    out = jnp.dot(sketch.astype(compute_dtype), wst_ref[...],
                  preferred_element_type=jnp.float32)
    o_ref[...] = (out + b_ref[...]).astype(o_ref.dtype)


def _round_up(x, n):
    return ((x + n - 1) // n) * n


@functools.partial(jax.jit, static_argnames=("tm", "compute_dtype"))
def svd_linear(x, U, W_s, b, *, tm=256, compute_dtype=jnp.bfloat16):
    """x: (..., in_dim), U: (m, in_dim), W_s: (out_dim, m), b: (out_dim,)."""
    in_dim = x.shape[-1]
    m = U.shape[0]
    out_dim = W_s.shape[0]
    lead_shape = x.shape[:-1]

    x2d = x.reshape(-1, in_dim)              # keep original dtype; cast in-kernel
    rows = x2d.shape[0]

    # Lane-dense padding of the rank (K of the 2nd dot) and output columns.
    m_pad = _round_up(m, _LANE)
    out_pad = _round_up(out_dim, _LANE)

    ut = U.T.astype(compute_dtype)           # (in_dim, m)
    wst = W_s.T.astype(compute_dtype)        # (m, out_dim)
    b2d = b.astype(jnp.float32).reshape(1, out_dim)
    if m_pad != m:
        ut = jnp.pad(ut, ((0, 0), (0, m_pad - m)))
        wst = jnp.pad(wst, ((0, m_pad - m), (0, 0)))
    if out_pad != out_dim:
        wst = jnp.pad(wst, ((0, 0), (0, out_pad - out_dim)))
        b2d = jnp.pad(b2d, ((0, 0), (0, out_pad - out_dim)))

    # Row tile: large tiles amortize per-grid-step pipeline overhead (~0.35us)
    # and fill the MXU M dimension.  No jnp.pad of x (a full extra HBM pass) --
    # Pallas masks the out-of-bounds part of the last (partial) block.
    if rows <= tm:
        tm_eff = rows                        # single block == full dim (always legal)
    else:
        tm_eff = max(16, (tm // 16) * 16)    # sublane-friendly for bf16 and f32
    grid = (pl.cdiv(rows, tm_eff),)

    elt = jnp.dtype(x.dtype).itemsize
    cbytes = jnp.dtype(compute_dtype).itemsize
    cost = pl.CostEstimate(
        flops=2 * rows * (in_dim * m_pad + m_pad * out_pad),
        transcendentals=0,
        bytes_accessed=(rows * in_dim * elt            # x
                        + in_dim * m_pad * cbytes      # U.T
                        + m_pad * out_pad * cbytes     # W_s.T
                        + out_pad * 4                  # bias
                        + rows * out_pad * elt),       # output
    )

    # NOTE: for very large m (>~2048) a K-reduction grid axis with an f32 VMEM
    # accumulator would bound the live (tm, m) sketch; not needed at these ranks.
    out2d = pl.pallas_call(
        functools.partial(_svd_linear_kernel, compute_dtype=compute_dtype),
        out_shape=jax.ShapeDtypeStruct((rows, out_pad), x.dtype),
        grid_spec=pltpu.PrefetchScalarGridSpec(
            num_scalar_prefetch=0,
            grid=grid,
            in_specs=[
                pl.BlockSpec((tm_eff, in_dim), lambda i: (i, 0)),
                # Grid-invariant operands: whole array resident in VMEM,
                # no double-buffering.
                pl.BlockSpec(memory_space=pltpu.MemorySpace.VMEM),
                pl.BlockSpec(memory_space=pltpu.MemorySpace.VMEM),
                pl.BlockSpec(memory_space=pltpu.MemorySpace.VMEM),
            ],
            out_specs=pl.BlockSpec((tm_eff, out_pad), lambda i: (i, 0)),
        ),
        compiler_params=pltpu.CompilerParams(
            dimension_semantics=("parallel",),
            vmem_limit_bytes=48 * 1024 * 1024,
        ),
        cost_estimate=cost,
    )(x2d, ut, wst, b2d)

    if out_pad != out_dim:
        out2d = out2d[:, :out_dim]
    return out2d.reshape(*lead_shape, out_dim)


def make_svd_linear_params(key, in_dim, out_dim, m):
    """Deterministically build W_s, U, b exactly as SvdLinear.__init__ does."""
    k_w, k_b = jax.random.split(key)
    # A synthetic "linear_layer.weight" / bias (torch.nn.Linear-like shapes).
    W = jax.random.normal(k_w, (out_dim, in_dim), dtype=jnp.float32) * 0.1
    b = jax.random.normal(k_b, (out_dim,), dtype=jnp.float32) * 0.1

    # torch.svd: W = U @ diag(S) @ V^T ; jnp.linalg.svd: W = U @ diag(S) @ Vh
    U_svd, S, Vh = jnp.linalg.svd(W, full_matrices=False)
    W_s = U_svd[:, :m] * S[:m][None, :]   # (out_dim, m) == U[:, :m] @ diag(S[:m])
    U = Vh[:m, :]                         # (m, in_dim)  == V[:, :m].T
    return W, W_s, U, b


if __name__ == "__main__":
    key = jax.random.PRNGKey(0)
    batch, seq, in_dim, out_dim, m = 2, 8, 32, 16, 8

    k_params, k_x = jax.random.split(key)
    W, W_s, U, b = make_svd_linear_params(k_params, in_dim, out_dim, m)
    x = jax.random.normal(k_x, (batch, seq, in_dim), dtype=jnp.float32)

    # Pure-JAX reference of the forward semantics.
    ref = jnp.matmul(jnp.matmul(x, U.T), W_s.T) + b

    # f32 compute path: tight check of the kernel math.
    out_f32 = jax.block_until_ready(
        svd_linear(x, U, W_s, b, compute_dtype=jnp.float32))
    assert out_f32.shape == (batch, seq, out_dim)
    assert jnp.allclose(out_f32, ref, atol=1e-5, rtol=1e-5)

    # Default (bf16 operands, f32 accumulation) path.
    out = jax.block_until_ready(svd_linear(x, U, W_s, b))
    assert out.shape == (batch, seq, out_dim)
    assert jnp.allclose(out, ref, atol=3e-2, rtol=3e-2)

    print("KERNEL_OK")
</pallas_src>

<mosaic_0001>
module attributes {stable_mosaic.version = 11 : i64} {
  func.func @_svd_linear_kernel(%arg0: i32, %arg1: memref<16x32xf32, #tpu.memory_space<vmem>>, %arg2: memref<32x128xf32, #tpu.memory_space<vmem>>, %arg3: memref<128x128xf32, #tpu.memory_space<vmem>>, %arg4: memref<1x128xf32, #tpu.memory_space<vmem>>, %arg5: memref<16x128xf32, #tpu.memory_space<vmem>>) attributes {dimension_semantics = [#tpu.dimension_semantics<parallel>], iteration_bounds = array<i64: 1>, scalar_prefetch = 0 : i64, scratch_operands = 0 : i64, tpu.core_type = #tpu.core_type<tc>, window_params = [{transform_indices = @transform_0, window_bounds = array<i64: 16, 32>}, {pipeline_mode = #tpu.pipeline_mode<synchronous>, transform_indices = @transform_1, window_bounds = array<i64: 32, 128>}, {pipeline_mode = #tpu.pipeline_mode<synchronous>, transform_indices = @transform_2, window_bounds = array<i64: 128, 128>}, {pipeline_mode = #tpu.pipeline_mode<synchronous>, transform_indices = @transform_3, window_bounds = array<i64: 1, 128>}, {transform_indices = @transform_4, window_bounds = array<i64: 16, 128>}]} {
    %c0 = arith.constant 0 : index
    %c0_0 = arith.constant 0 : index
    %0 = vector.load %arg1[%c0, %c0_0] : memref<16x32xf32, #tpu.memory_space<vmem>>, vector<16x32xf32>
    %c0_1 = arith.constant 0 : index
    %c0_2 = arith.constant 0 : index
    %1 = vector.load %arg2[%c0_1, %c0_2] : memref<32x128xf32, #tpu.memory_space<vmem>>, vector<32x128xf32>
    %cst = arith.constant dense<0.000000e+00> : vector<16x128xf32>
    %2 = tpu.matmul %0, %1, %cst {dimension_numbers = #tpu.dot_dimension_numbers<[1], [0], [0], [1], [0, 0, 1, 1], [], []>} : vector<16x32xf32>, vector<32x128xf32>, vector<16x128xf32> -> vector<16x128xf32>
    %c0_3 = arith.constant 0 : index
    %c0_4 = arith.constant 0 : index
    %3 = vector.load %arg3[%c0_3, %c0_4] : memref<128x128xf32, #tpu.memory_space<vmem>>, vector<128x128xf32>
    %cst_5 = arith.constant dense<0.000000e+00> : vector<16x128xf32>
    %4 = tpu.matmul %2, %3, %cst_5 {dimension_numbers = #tpu.dot_dimension_numbers<[1], [0], [0], [1], [0, 0, 1, 1], [], []>} : vector<16x128xf32>, vector<128x128xf32>, vector<16x128xf32> -> vector<16x128xf32>
    %c0_6 = arith.constant 0 : index
    %c0_7 = arith.constant 0 : index
    %5 = vector.load %arg4[%c0_6, %c0_7] : memref<1x128xf32, #tpu.memory_space<vmem>>, vector<1x128xf32>
    %6 = vector.broadcast %5 : vector<1x128xf32> to vector<16x128xf32>
    %7 = arith.addf %4, %6 : vector<16x128xf32>
    %c0_8 = arith.constant 0 : index
    %c0_9 = arith.constant 0 : index
    %8 = vector.load %arg5[%c0_8, %c0_9] : memref<16x128xf32, #tpu.memory_space<vmem>>, vector<16x128xf32>
    tpu.vector_store %arg5[%c0_8, %c0_9], %7 {strides = array<i32>} : memref<16x128xf32, #tpu.memory_space<vmem>>, vector<16x128xf32>,
    return
  }
  func.func @transform_0(%arg0: i32) -> (i32, i32) {
    %c0_i32 = arith.constant 0 : i32
    %c0_i32_0 = arith.constant 0 : i32
    return %arg0, %c0_i32 : i32, i32
  }
  func.func @transform_1(%arg0: i32) -> (i32, i32) {
    %c0_i32 = arith.constant 0 : i32
    %c0_i32_0 = arith.constant 0 : i32
    %c0_i32_1 = arith.constant 0 : i32
    return %c0_i32, %c0_i32_0 : i32, i32
  }
  func.func @transform_2(%arg0: i32) -> (i32, i32) {
    %c0_i32 = arith.constant 0 : i32
    %c0_i32_0 = arith.constant 0 : i32
    %c0_i32_1 = arith.constant 0 : i32
    return %c0_i32, %c0_i32_0 : i32, i32
  }
  func.func @transform_3(%arg0: i32) -> (i32, i32) {
    %c0_i32 = arith.constant 0 : i32
    %c0_i32_0 = arith.constant 0 : i32
    %c0_i32_1 = arith.constant 0 : i32
    return %c0_i32, %c0_i32_0 : i32, i32
  }
  func.func @transform_4(%arg0: i32) -> (i32, i32) {
    %c0_i32 = arith.constant 0 : i32
    %c0_i32_0 = arith.constant 0 : i32
    return %arg0, %c0_i32 : i32, i32
  }
}

</mosaic_0001>

<bundles_post_ra>
// kernel: svd_linear.1
= control target key start
LH: loop header
LB: loop body
LE: loop exit
PB: predicated region body
PF: predicated region fallthrough
CT: control target
= control target key end

     0   :  { %vm23_vm0 = vcmask 261120   ;;  %s384_s1 = inlined_call_operand.vmem [shape: f32[32,128], index: 1, kind: input, shape index: {}]   ;;  %s385_s0 = inlined_call_operand.vmem [shape: f32[16,32], index: 0, kind: input, shape index: {}]   ;;  %s386_s2 = inlined_call_operand.vmem [shape: f32[128,128], index: 2, kind: input, shape index: {}]   ;;  %s387_s3 = inlined_call_operand.vmem [shape: f32[1,128], index: 3, kind: input, shape index: {}]   ;;  %s388_s4 = inlined_call_operand.vmem [shape: f32[16,128], index: 4, kind: output, shape index: {}]  }
   0x1   :  { %v22_v0 = vld [vmem:[%s384_s1 + $0x18] sm:$0xff]  ;;  %v21_v1 = vld [vmem:[%s384_s1 + $0x10] sm:$0xff]  ;;  %v17_v2 = vld [vmem:[%s385_s0] sm:$0xff] }
   0x2   :  { %236 = vmatprep.subr.mxu0 %v22_v0  ;;  %v20_v3 = vld [vmem:[%s384_s1 + $0x8] sm:$0xff]  ;;  %244 = vmatprep.mubr.msk.f32.mxu0 %vm23_vm0, %v17_v2  ;;  %v120_v4 = vld [vmem:[%s386_s2 + $0x78] sm:$0xff]  ;;  %v119_v5 = vld [vmem:[%s386_s2 + $0x70] sm:$0xff] }
   0x3   :  { %237 = vmatpush3.msra.mxu0 %v22_v0  ;;  %247 = vmatprep.subr.mxu1 %v120_v4  ;;  %v19_v6 = vld [vmem:[%s384_s1] sm:$0xff]  ;;  %v118_v7 = vld [vmem:[%s386_s2 + $0x68] sm:$0xff]  ;;  %v116_v10 = vld [vmem:[%s386_s2 + $0x58] sm:$0xff] }
   0x4   :  { %238 = vmatprep.subr.mxu0 %v21_v1  ;;  %248 = vmatpush3.msra.mxu1 %v120_v4  ;;  %v18_v8 = vld [vmem:[%s385_s0 + $0x8] sm:$0xff]  ;;  %v117_v9 = vld [vmem:[%s386_s2 + $0x60] sm:$0xff]  ;;  %v115_v11 = vld [vmem:[%s386_s2 + $0x50] sm:$0xff] }
   0x5   :  { %239 = vmatpush3.msra.mxu0 %v21_v1  ;;  %249 = vmatprep.subr.mxu1 %v119_v5  ;;  %v114_v12 = vld [vmem:[%s386_s2 + $0x48] sm:$0xff]  ;;  %v113_v13 = vld [vmem:[%s386_s2 + $0x40] sm:$0xff]  ;;  %v112_v14 = vld [vmem:[%s386_s2 + $0x38] sm:$0xff] }
   0x6   :  { %240 = vmatprep.subr.mxu0 %v20_v3  ;;  %250 = vmatpush3.msra.mxu1 %v119_v5  ;;  %v111_v15 = vld [vmem:[%s386_s2 + $0x30] sm:$0xff]  ;;  %v110_v16 = vld [vmem:[%s386_s2 + $0x28] sm:$0xff]  ;;  %v109_v17 = vld [vmem:[%s386_s2 + $0x20] sm:$0xff] }
   0x7   :  { %241 = vmatpush3.msra.mxu0 %v20_v3  ;;  %251 = vmatprep.subr.mxu1 %v118_v7  ;;  %v108_v18 = vld [vmem:[%s386_s2 + $0x18] sm:$0xff]  ;;  %v107_v19 = vld [vmem:[%s386_s2 + $0x10] sm:$0xff]  ;;  %v106_v20 = vld [vmem:[%s386_s2 + $0x8] sm:$0xff] }
   0x8   :  { %242 = vmatprep.subr.mxu0 %v19_v6  ;;  %252 = vmatpush3.msra.mxu1 %v118_v7  ;;  %v105_v21 = vld [vmem:[%s386_s2] sm:$0xff] }
   0x9   :  { %243 = vmatpush3.msra.mxu0 %v19_v6  ;;  %253 = vmatprep.subr.mxu1 %v117_v9  ;;  %v211_v24 = vld [vmem:[%s387_s3] ss:$0 sm:$0xff] }
   0xa   :  { %245 = vmatmul.mubr.msk.f32.vlgmr.msra.gmra.mxu0 %vm23_vm0, %v18_v8  ;;  %254 = vmatpush3.msra.mxu1 %v117_v9 }
   0xb   :  { %255 = vmatprep.subr.mxu1 %v116_v10 }
   0xc   :  { %256 = vmatpush3.msra.mxu1 %v116_v10 }
   0xd   :  { %257 = vmatprep.subr.mxu1 %v115_v11 }
   0xe   :  { %258 = vmatpush3.msra.mxu1 %v115_v11 }
   0xf   :  { %259 = vmatprep.subr.mxu1 %v114_v12 }
  0x10   :  { %260 = vmatpush3.msra.mxu1 %v114_v12 }
  0x11   :  { %261 = vmatprep.subr.mxu1 %v113_v13 }
  0x12   :  { %262 = vmatpush3.msra.mxu1 %v113_v13 }
  0x13   :  { %263 = vmatprep.subr.mxu1 %v112_v14 }
  0x14   :  { %264 = vmatpush3.msra.mxu1 %v112_v14 }
  0x15   :  { %265 = vmatprep.subr.mxu1 %v111_v15 }
  0x16   :  { %266 = vmatpush3.msra.mxu1 %v111_v15 }
  0x17   :  { %267 = vmatprep.subr.mxu1 %v110_v16 }
  0x18   :  { %268 = vmatpush3.msra.mxu1 %v110_v16 }
  0x19   :  { %269 = vmatprep.subr.mxu1 %v109_v17 }
  0x1a   :  { %270 = vmatpush3.msra.mxu1 %v109_v17 }
  0x1b   :  { %271 = vmatprep.subr.mxu1 %v108_v18 }
  0x1c   :  { %272 = vmatpush3.msra.mxu1 %v108_v18 }
  0x1d   :  { %273 = vmatprep.subr.mxu1 %v107_v19 }
  0x1e   :  { %274 = vmatpush3.msra.mxu1 %v107_v19 }
  0x1f   :  { %275 = vmatprep.subr.mxu1 %v106_v20 }
  0x20   :  { %276 = vmatpush3.msra.mxu1 %v106_v20 }
  0x21   :  { %277 = vmatprep.subr.mxu1 %v105_v21 }
  0x22   :  { %278 = vmatpush3.msra.mxu1 %v105_v21 }
  0xca   :  { %v246_v22 = vpop.f32.mrf.mxu0 }
  0xcc   :  { %v96_v23 = vpop.f32.mrf.mxu0 }
  0xcd   :  { %279 = vmatprep.mubr.f32.mxu1 %v96_v23 }
  0xce   :  { %280 = vmatmul.mubr.f32.vlgmr.msra.gmra.mxu1 %v246_v22 }
 0x18e   :  { %v281_v25 = vpop.f32.mrf.mxu1 }
 0x18f   :  { %v200_v26 = vadd.f32 %v281_v25, %v211_v24 }
 0x190   :  { %v194_v27 = vpop.f32.mrf.mxu1 }
 0x191   :  { %204 = vst [vmem:[%s388_s4 + $0x8] sm:$0xff] %v200_v26  ;;  %v195_v28 = vadd.f32 %v211_v24, %v194_v27 }
 0x193   :  { %203 = vst [vmem:[%s388_s4] sm:$0xff] %v195_v28 }

</bundles_post_ra>
